<compile_context>
chip_gen: v7x
topology: tpu7x:2x2x1
jax: 0.10.0
libtpu: 0.0.40
codegen_flags: <defaults>
</compile_context>

<pallas_src>
import functools

import jax
import jax.numpy as jnp
from jax.experimental import pallas as pl
from jax.experimental.pallas import tpu as pltpu


def _mlp_kernel(*refs, num_hidden, use_relu):
    if num_hidden > 0:
        (x_ref, w_in_ref, b_ref, w_h_ref, w_out_ref, b_out_ref, o_ref) = refs
    else:
        (x_ref, w_in_ref, b_ref, w_out_ref, b_out_ref, o_ref) = refs
        w_h_ref = None

    # Normalization is folded into w_in/b_in in the wrapper, so the body is
    # pure matmul + bias + (optional) ReLU.  f32 accumulation on the MXU.
    x = x_ref[...].astype(jnp.float32)
    h = jnp.dot(x, w_in_ref[...], preferred_element_type=jnp.float32) + b_ref[0]
    if use_relu:
        h = jnp.maximum(h, 0.0)

    for i in range(num_hidden):          # statically unrolled (tiny, fixed)
        h = jnp.dot(h, w_h_ref[i], preferred_element_type=jnp.float32) + b_ref[i + 1]
        if use_relu:
            h = jnp.maximum(h, 0.0)

    # De-normalization is folded into w_out/b_out; output columns are padded
    # to a multiple of 128 so this is an unmasked, lane-dense store.
    y = jnp.dot(h, w_out_ref[...], preferred_element_type=jnp.float32) + b_out_ref[...]
    o_ref[...] = y.astype(o_ref.dtype)


def _fold_normalizers(params):
    """Fold optional input/output normalizers into the first/last layers."""
    (xmin, xmax, ymin, ymax, w_in, b_in, w_h, b_h, w_out, b_out) = params

    if xmin is not None and xmax is not None:
        inv_range = 1.0 / (xmax - xmin)                 # [1, d_in]
        w_in_f = inv_range.reshape(-1, 1) * w_in        # scale input rows
        b_in_f = b_in - (xmin * inv_range) @ w_in       # [1, H]
    else:
        w_in_f, b_in_f = w_in, b_in

    if ymin is not None and ymax is not None:
        yrange = ymax - ymin                            # [1, out]
        w_out_f = w_out * yrange
        b_out_f = b_out * yrange + ymin
    else:
        w_out_f, b_out_f = w_out, b_out

    return w_in_f, b_in_f, w_h, b_h, w_out_f, b_out_f


def delayed_mlp_forward(x, params, *, use_relu=True, tile_m=256):
    """Fused DelayedMLP forward.

    tile_m: batch tile per grid step.  256 rows matches the MXU M cadence;
    the resident weight stack plus 2x pipelined (tile_m x d_in) and
    (tile_m x out_pad) f32 buffers stay far below v7x's 64 MiB VMEM.
    """
    w_in_f, b_in_f, w_h, b_h, w_out_f, b_out_f = _fold_normalizers(params)
    num_hidden = 0 if w_h is None else int(w_h.shape[0])

    batch, d_in = x.shape
    out_size = w_out_f.shape[1]

    # Lane-dense output: pad the feature dim to a multiple of 128 so stores
    # are unmasked full-lane vst; slice the real columns back outside.
    out_pad = ((out_size + 127) // 128) * 128
    if out_pad != out_size:
        w_out_f = jnp.pad(w_out_f, ((0, 0), (0, out_pad - out_size)))
        b_out_f = jnp.pad(b_out_f, ((0, 0), (0, out_pad - out_size)))

    # Pack input + hidden biases into one stacked operand (fewer tiny DMAs).
    if num_hidden > 0:
        biases = jnp.concatenate([b_in_f[None], b_h], axis=0)   # [nh+1, 1, H]
    else:
        biases = b_in_f[None]                                    # [1, 1, H]

    # Batch tiling: one grid point for small batches; otherwise a "parallel"
    # grid over batch (megacore-shardable on v7x, DMA-pipelined x/o tiles)
    # with all weights held VMEM-resident via constant index_maps.
    if batch <= tile_m:
        tm = batch
        padded_batch = batch
    else:
        tm = tile_m
        padded_batch = ((batch + tm - 1) // tm) * tm
        if padded_batch != batch:
            x = jnp.pad(x, ((0, padded_batch - batch), (0, 0)))
    grid_m = padded_batch // tm

    const2 = lambda i: (0, 0)
    const3 = lambda i: (0, 0, 0)

    in_specs = [
        pl.BlockSpec((tm, d_in), lambda i: (i, 0)),      # x: tiled over batch
        pl.BlockSpec(w_in_f.shape, const2),              # weights: resident
        pl.BlockSpec(biases.shape, const3),
    ]
    operands = [x, w_in_f, biases]
    if num_hidden > 0:
        in_specs.append(pl.BlockSpec(w_h.shape, const3))
        operands.append(w_h)
    in_specs += [pl.BlockSpec(w_out_f.shape, const2),
                 pl.BlockSpec(b_out_f.shape, const2)]
    operands += [w_out_f, b_out_f]

    kernel = functools.partial(_mlp_kernel, num_hidden=num_hidden,
                               use_relu=use_relu)
    out = pl.pallas_call(
        kernel,
        out_shape=jax.ShapeDtypeStruct((padded_batch, out_pad), jnp.float32),
        grid=(grid_m,),
        in_specs=in_specs,
        out_specs=pl.BlockSpec((tm, out_pad), lambda i: (i, 0)),
        compiler_params=pltpu.CompilerParams(
            dimension_semantics=("parallel",)),
    )(*operands)

    return out[:batch, :out_size]


def _reference_forward(x, params, *, use_relu=True):
    (xmin, xmax, ymin, ymax, w_in, b_in, w_h, b_h, w_out, b_out) = params
    if xmin is not None and xmax is not None:
        x = (x - xmin) / (xmax - xmin)
    h = x @ w_in + b_in
    if use_relu:
        h = jnp.maximum(h, 0.0)
    nh = 0 if w_h is None else w_h.shape[0]
    for i in range(nh):
        h = h @ w_h[i] + b_h[i]
        if use_relu:
            h = jnp.maximum(h, 0.0)
    y = h @ w_out + b_out
    if ymin is not None and ymax is not None:
        y = y * (ymax - ymin) + ymin
    return y


if __name__ == "__main__":
    # Module hyperparameters (small, consistent with the PyTorch module).
    input_size = 4
    len_history = 4
    hidden_size = 32
    num_layers = 2          # 1 input layer + (num_layers - 1) hidden layers
    output_size = 4
    batch = 8

    d_in = input_size * len_history
    num_hidden = num_layers - 1

    key = jax.random.PRNGKey(0)
    keys = jax.random.split(key, 8)

    # Deterministic synthetic parameters (nn.Linear shapes, stored [in, out]).
    w_in = jax.random.normal(keys[0], (d_in, hidden_size), jnp.float32) * 0.1
    b_in = jax.random.normal(keys[1], (1, hidden_size), jnp.float32) * 0.1
    w_h = jax.random.normal(keys[2], (num_hidden, hidden_size, hidden_size),
                            jnp.float32) * 0.1
    b_h = jax.random.normal(keys[3], (num_hidden, 1, hidden_size),
                            jnp.float32) * 0.1
    w_out = jax.random.normal(keys[4], (hidden_size, output_size), jnp.float32) * 0.1
    b_out = jax.random.normal(keys[5], (1, output_size), jnp.float32) * 0.1

    # Normalizer params (input_normalizer_params / output_normalizer_params).
    x_min = jnp.full((1, d_in), -2.0, jnp.float32)
    x_max = jnp.full((1, d_in), 2.0, jnp.float32)
    y_min = jnp.full((1, output_size), -1.0, jnp.float32)
    y_max = jnp.full((1, output_size), 3.0, jnp.float32)

    params = (x_min, x_max, y_min, y_max, w_in, b_in, w_h, b_h, w_out, b_out)

    # --- small-batch (single grid point) path ---
    x = jax.random.normal(keys[6], (batch, d_in), jnp.float32)
    out = jax.block_until_ready(delayed_mlp_forward(x, params, use_relu=True))
    ref = _reference_forward(x, params, use_relu=True)
    assert out.shape == (batch, output_size)
    assert jnp.allclose(out, ref, atol=1e-4, rtol=1e-4), "mismatch (small batch)"

    # --- tiled multi-grid-point path (batch not a tile multiple) ---
    x_big = jax.random.normal(keys[7], (300, d_in), jnp.float32)
    out_big = jax.block_until_ready(
        delayed_mlp_forward(x_big, params, use_relu=True, tile_m=128))
    ref_big = _reference_forward(x_big, params, use_relu=True)
    assert out_big.shape == (300, output_size)
    assert jnp.allclose(out_big, ref_big, atol=1e-4, rtol=1e-4), "mismatch (tiled)"

    # --- num_layers == 1 path (no hidden stack passed to the kernel) ---
    params_nh = (x_min, x_max, y_min, y_max, w_in, b_in, None, None, w_out, b_out)
    out_nh = jax.block_until_ready(delayed_mlp_forward(x, params_nh, use_relu=True))
    ref_nh = _reference_forward(x, params_nh, use_relu=True)
    assert jnp.allclose(out_nh, ref_nh, atol=1e-4, rtol=1e-4), "mismatch (no hidden)"

    # --- no normalizers + identity activation (module defaults) ---
    params_plain = (None, None, None, None, w_in, b_in, w_h, b_h, w_out, b_out)
    out_pl = jax.block_until_ready(
        delayed_mlp_forward(x, params_plain, use_relu=False))
    ref_pl = _reference_forward(x, params_plain, use_relu=False)
    assert jnp.allclose(out_pl, ref_pl, atol=1e-4, rtol=1e-4), "mismatch (plain)"

    print("KERNEL_OK")
</pallas_src>

<mosaic_0001>
module attributes {stable_mosaic.version = 11 : i64} {
  func.func @_mlp_kernel(%arg0: i32, %arg1: memref<8x16xf32, #tpu.memory_space<vmem>>, %arg2: memref<16x32xf32, #tpu.memory_space<vmem>>, %arg3: memref<2x1x32xf32, #tpu.memory_space<vmem>>, %arg4: memref<1x32x32xf32, #tpu.memory_space<vmem>>, %arg5: memref<32x128xf32, #tpu.memory_space<vmem>>, %arg6: memref<1x128xf32, #tpu.memory_space<vmem>>, %arg7: memref<8x128xf32, #tpu.memory_space<vmem>>) attributes {dimension_semantics = [#tpu.dimension_semantics<parallel>], iteration_bounds = array<i64: 1>, scalar_prefetch = 0 : i64, scratch_operands = 0 : i64, tpu.core_type = #tpu.core_type<tc>, window_params = [{transform_indices = @transform_0, window_bounds = array<i64: 8, 16>}, {pipeline_mode = #tpu.pipeline_mode<synchronous>, transform_indices = @transform_1, window_bounds = array<i64: 16, 32>}, {pipeline_mode = #tpu.pipeline_mode<synchronous>, transform_indices = @transform_2, window_bounds = array<i64: 2, 1, 32>}, {pipeline_mode = #tpu.pipeline_mode<synchronous>, transform_indices = @transform_3, window_bounds = array<i64: 1, 32, 32>}, {pipeline_mode = #tpu.pipeline_mode<synchronous>, transform_indices = @transform_4, window_bounds = array<i64: 32, 128>}, {pipeline_mode = #tpu.pipeline_mode<synchronous>, transform_indices = @transform_5, window_bounds = array<i64: 1, 128>}, {transform_indices = @transform_6, window_bounds = array<i64: 8, 128>}]} {
    %c0 = arith.constant 0 : index
    %c0_0 = arith.constant 0 : index
    %0 = vector.load %arg1[%c0, %c0_0] : memref<8x16xf32, #tpu.memory_space<vmem>>, vector<8x16xf32>
    %c0_1 = arith.constant 0 : index
    %c0_2 = arith.constant 0 : index
    %1 = vector.load %arg2[%c0_1, %c0_2] : memref<16x32xf32, #tpu.memory_space<vmem>>, vector<16x32xf32>
    %cst = arith.constant dense<0.000000e+00> : vector<8x32xf32>
    %2 = tpu.matmul %0, %1, %cst {dimension_numbers = #tpu.dot_dimension_numbers<[1], [0], [0], [1], [0, 0, 1, 1], [], []>} : vector<8x16xf32>, vector<16x32xf32>, vector<8x32xf32> -> vector<8x32xf32>
    %c0_3 = arith.constant 0 : index
    %c0_4 = arith.constant 0 : index
    %c0_5 = arith.constant 0 : index
    %3 = vector.load %arg3[%c0_3, %c0_4, %c0_5] : memref<2x1x32xf32, #tpu.memory_space<vmem>>, vector<1x1x32xf32>
    %4 = vector.shape_cast %3 : vector<1x1x32xf32> to vector<1x32xf32>
    %5 = vector.broadcast %4 : vector<1x32xf32> to vector<8x32xf32>
    %6 = arith.addf %2, %5 : vector<8x32xf32>
    %cst_6 = arith.constant 0.000000e+00 : f32
    %7 = vector.broadcast %cst_6 : f32 to vector<8x32xf32>
    %8 = arith.maximumf %6, %7 : vector<8x32xf32>
    %c0_7 = arith.constant 0 : index
    %c0_8 = arith.constant 0 : index
    %c0_9 = arith.constant 0 : index
    %9 = vector.load %arg4[%c0_7, %c0_8, %c0_9] : memref<1x32x32xf32, #tpu.memory_space<vmem>>, vector<1x32x32xf32>
    %10 = vector.shape_cast %9 : vector<1x32x32xf32> to vector<32x32xf32>
    %cst_10 = arith.constant dense<0.000000e+00> : vector<8x32xf32>
    %11 = tpu.matmul %8, %10, %cst_10 {dimension_numbers = #tpu.dot_dimension_numbers<[1], [0], [0], [1], [0, 0, 1, 1], [], []>} : vector<8x32xf32>, vector<32x32xf32>, vector<8x32xf32> -> vector<8x32xf32>
    %c1 = arith.constant 1 : index
    %c0_11 = arith.constant 0 : index
    %c0_12 = arith.constant 0 : index
    %12 = vector.load %arg3[%c1, %c0_11, %c0_12] : memref<2x1x32xf32, #tpu.memory_space<vmem>>, vector<1x1x32xf32>
    %13 = vector.shape_cast %12 : vector<1x1x32xf32> to vector<1x32xf32>
    %14 = vector.broadcast %13 : vector<1x32xf32> to vector<8x32xf32>
    %15 = arith.addf %11, %14 : vector<8x32xf32>
    %cst_13 = arith.constant 0.000000e+00 : f32
    %16 = vector.broadcast %cst_13 : f32 to vector<8x32xf32>
    %17 = arith.maximumf %15, %16 : vector<8x32xf32>
    %c0_14 = arith.constant 0 : index
    %c0_15 = arith.constant 0 : index
    %18 = vector.load %arg5[%c0_14, %c0_15] : memref<32x128xf32, #tpu.memory_space<vmem>>, vector<32x128xf32>
    %cst_16 = arith.constant dense<0.000000e+00> : vector<8x128xf32>
    %19 = tpu.matmul %17, %18, %cst_16 {dimension_numbers = #tpu.dot_dimension_numbers<[1], [0], [0], [1], [0, 0, 1, 1], [], []>} : vector<8x32xf32>, vector<32x128xf32>, vector<8x128xf32> -> vector<8x128xf32>
    %c0_17 = arith.constant 0 : index
    %c0_18 = arith.constant 0 : index
    %20 = vector.load %arg6[%c0_17, %c0_18] : memref<1x128xf32, #tpu.memory_space<vmem>>, vector<1x128xf32>
    %21 = vector.broadcast %20 : vector<1x128xf32> to vector<8x128xf32>
    %22 = arith.addf %19, %21 : vector<8x128xf32>
    %c0_19 = arith.constant 0 : index
    %c0_20 = arith.constant 0 : index
    %23 = vector.load %arg7[%c0_19, %c0_20] : memref<8x128xf32, #tpu.memory_space<vmem>>, vector<8x128xf32>
    tpu.vector_store %arg7[%c0_19, %c0_20], %22 {strides = array<i32>} : memref<8x128xf32, #tpu.memory_space<vmem>>, vector<8x128xf32>,
    return
  }
  func.func @transform_0(%arg0: i32) -> (i32, i32) {
    %c0_i32 = arith.constant 0 : i32
    %c0_i32_0 = arith.constant 0 : i32
    return %arg0, %c0_i32 : i32, i32
  }
  func.func @transform_1(%arg0: i32) -> (i32, i32) {
    %c0_i32 = arith.constant 0 : i32
    %c0_i32_0 = arith.constant 0 : i32
    %c0_i32_1 = arith.constant 0 : i32
    return %c0_i32, %c0_i32_0 : i32, i32
  }
  func.func @transform_2(%arg0: i32) -> (i32, i32, i32) {
    %c0_i32 = arith.constant 0 : i32
    %c0_i32_0 = arith.constant 0 : i32
    %c0_i32_1 = arith.constant 0 : i32
    %c0_i32_2 = arith.constant 0 : i32
    return %c0_i32, %c0_i32_0, %c0_i32_1 : i32, i32, i32
  }
  func.func @transform_3(%arg0: i32) -> (i32, i32, i32) {
    %c0_i32 = arith.constant 0 : i32
    %c0_i32_0 = arith.constant 0 : i32
    %c0_i32_1 = arith.constant 0 : i32
    %c0_i32_2 = arith.constant 0 : i32
    return %c0_i32, %c0_i32_0, %c0_i32_1 : i32, i32, i32
  }
  func.func @transform_4(%arg0: i32) -> (i32, i32) {
    %c0_i32 = arith.constant 0 : i32
    %c0_i32_0 = arith.constant 0 : i32
    %c0_i32_1 = arith.constant 0 : i32
    return %c0_i32, %c0_i32_0 : i32, i32
  }
  func.func @transform_5(%arg0: i32) -> (i32, i32) {
    %c0_i32 = arith.constant 0 : i32
    %c0_i32_0 = arith.constant 0 : i32
    %c0_i32_1 = arith.constant 0 : i32
    return %c0_i32, %c0_i32_0 : i32, i32
  }
  func.func @transform_6(%arg0: i32) -> (i32, i32) {
    %c0_i32 = arith.constant 0 : i32
    %c0_i32_0 = arith.constant 0 : i32
    return %arg0, %c0_i32 : i32, i32
  }
}

</mosaic_0001>

<bundles_post_ra>
// kernel: tpu_custom_call.1
= control target key start
LH: loop header
LB: loop body
LE: loop exit
PB: predicated region body
PF: predicated region fallthrough
CT: control target
= control target key end

     0   :  { %11 = vsyncpa [#allocation3], 0  ;;  %s669_s0 = inlined_call_operand.hbm [shape: f32[8,16], index: 0, kind: input, shape index: {}]   ;;  %s670_s1 = inlined_call_operand.hbm [shape: f32[16,32], index: 1, kind: input, shape index: {}]   ;;  %s671_s2 = inlined_call_operand.vmem [shape: f32[2,1,32], index: 2, kind: input, shape index: {}]   ;;  %s672_s3 = inlined_call_operand.hbm [shape: f32[1,32,32], index: 3, kind: input, shape index: {}]   ;;  %s673_s4 = inlined_call_operand.hbm [shape: f32[32,128], index: 4, kind: input, shape index: {}]   ;;  %s674_s5 = inlined_call_operand.vmem [shape: f32[1,128], index: 5, kind: input, shape index: {}]   ;;  %s675_s6 = inlined_call_operand.hbm [shape: f32[8,128], index: 6, kind: output, shape index: {}]  }
   0x1   :  { %12 = vsyncpa [#allocation6], 0 }
   0x2   :  { %13 = vsyncpa [#allocation9], 0 }
   0x3   :  { %14 = vsyncpa [#allocation4], 0  ;;  %s543_s21 = smov [#allocation5]   ;;  %s425_s25 = scalar_lea.hbm %s670_s1, 256 }
   0x4   :  { %s30_s22 = sshll.u32 %s543_s21, 4  ;;  %p426_p0 = scmp.ne.s32.totalorder %s670_s1, %s425_s25  ;;  %s31_s22 = int_to_ptr.vmem [resolvable:$true] %s30_s22 }
   0x5   :  { %p429_p1 = scmp.lt.u32.totalorder %s425_s25, %s670_s1 }
   0x7   :  { %p431_p2 = pnand %p429_p1, %p426_p0 }
   0x9   :  { %434 = shalt.err (!%p431_p2)
}
   0xa   :  { %s435_s30 = scalar_lea.vmem %s31_s22, 256  ;;  %p440_p4 = scmp.lt.s32.totalorder %s31_s22, %s31_s22 }
   0xb   :  { %p436_p3 = scmp.ne.s32.totalorder %s31_s22, %s435_s30  ;;  %p441_p5 = scmp.lt.s32.totalorder %s435_s30, %s435_s30 }
   0xd   :  { %p442_p6 = por %p441_p5, %p440_p4 }
   0xf   :  { %p443_p7 = pnand %p442_p6, %p436_p3 }
  0x11   :  { %446 = shalt.err (!%p443_p7)
}
  0x12   :  { %s544_s7 = smov 128   ;;  %s545_s8 = smov 8  }
  0x13   :  { %36 = dma.hbm_to_vmem [thread:$0]  %s670_s1, 256, %s31_s22, [#allocation6], %s544_s7, %s544_s7, %s545_s8  }
  0x14   :  { %s546_s11 = smov [#allocation2]   ;;  %s547_s13 = smov [#allocation7]  }
  0x15   :  { %s21_s12 = sshll.u32 %s546_s11, 4  ;;  %s44_s14 = sshll.u32 %s547_s13, 4  ;;  %s22_s12 = int_to_ptr.vmem [resolvable:$true] %s21_s12  ;;  %s45_s14 = int_to_ptr.vmem [resolvable:$true] %s44_s14 }
  0x16   :  { %s447_s17 = scalar_lea.hbm %s669_s0, 128 }
  0x17   :  { %p448_p8 = scmp.ne.s32.totalorder %s669_s0, %s447_s17  ;;  %p451_p9 = scmp.lt.u32.totalorder %s447_s17, %s669_s0 }
  0x19   :  { %p453_p10 = pnand %p451_p9, %p448_p8 }
  0x1b   :  { %456 = shalt.err (!%p453_p10)
}
  0x1c   :  { %s457_s1 = scalar_lea.vmem %s22_s12, 128  ;;  %p462_p12 = scmp.lt.s32.totalorder %s22_s12, %s22_s12 }
  0x1d   :  { %p458_p11 = scmp.ne.s32.totalorder %s22_s12, %s457_s1  ;;  %p463_p13 = scmp.lt.s32.totalorder %s457_s1, %s457_s1 }
  0x1f   :  { %p464_p0 = por %p463_p13, %p462_p12 }
  0x21   :  { %p465_p1 = pnand %p464_p0, %p458_p11 }
  0x23   :  { %468 = shalt.err (!%p465_p1)
}
  0x24   :  { %24 = dma.hbm_to_vmem [thread:$0]  %s669_s0, 128, %s22_s12, [#allocation3]  }
  0x25   :  { %s469_s26 = scalar_lea.hbm %s672_s3, 512 }
  0x26   :  { %p470_p2 = scmp.ne.s32.totalorder %s672_s3, %s469_s26  ;;  %p473_p3 = scmp.lt.u32.totalorder %s469_s26, %s672_s3 }
  0x28   :  { %p475_p4 = pnand %p473_p3, %p470_p2 }
  0x2a   :  { %478 = shalt.err (!%p475_p4)
}
  0x2b   :  { %s479_s9 = scalar_lea.vmem %s45_s14, 512  ;;  %p484_p6 = scmp.lt.s32.totalorder %s45_s14, %s45_s14 }
  0x2c   :  { %p480_p5 = scmp.ne.s32.totalorder %s45_s14, %s479_s9  ;;  %p485_p7 = scmp.lt.s32.totalorder %s479_s9, %s479_s9 }
  0x2e   :  { %p486_p8 = por %p485_p7, %p484_p6 }
  0x30   :  { %p487_p9 = pnand %p486_p8, %p480_p5 }
  0x32   :  { %490 = shalt.err (!%p487_p9)
}
  0x33   :  { %50 = dma.hbm_to_vmem [thread:$0]  %s672_s3, 512, %s45_s14, [#allocation6], %s544_s7, %s544_s7, %s545_s8  }
  0x34   :  { %s548_s11 = smov [#allocation8]   ;;  %s491_s16 = scalar_lea.hbm %s673_s4, 512 }
  0x35   :  { %s56_s12 = sshll.u32 %s548_s11, 4  ;;  %p492_p10 = scmp.ne.s32.totalorder %s673_s4, %s491_s16  ;;  %s57_s12 = int_to_ptr.vmem [resolvable:$true] %s56_s12 }
  0x36   :  { %p495_p11 = scmp.lt.u32.totalorder %s491_s16, %s673_s4 }
  0x38   :  { %p497_p12 = pnand %p495_p11, %p492_p10 }
  0x3a   :  { %500 = shalt.err (!%p497_p12)
}
  0x3b   :  { %s501_s21 = scalar_lea.vmem %s57_s12, 512  ;;  %p506_p0 = scmp.lt.s32.totalorder %s57_s12, %s57_s12 }
  0x3c   :  { %p502_p13 = scmp.ne.s32.totalorder %s57_s12, %s501_s21  ;;  %p507_p1 = scmp.lt.s32.totalorder %s501_s21, %s501_s21 }
  0x3e   :  { %p508_p2 = por %p507_p1, %p506_p0 }
  0x40   :  { %p509_p3 = pnand %p508_p2, %p502_p13 }
  0x42   :  { %512 = shalt.err (!%p509_p3)
}
  0x43   :  { %62 = dma.hbm_to_vmem [thread:$0]  %s673_s4, 512, %s57_s12, [#allocation9], %s544_s7, %s544_s7, %s545_s8  }
  0x44   :  { %535 = dma.done.wait [#allocation3], 128  }
  0x45   :  { %536 = vsyncadd [#allocation3], 4294967168 }
  0x46   :  { %537 = dma.done.wait [#allocation6], 768  }
  0x47   :  { %538 = vsyncadd [#allocation6], 4294966528 }
  0x48   :  { %539 = dma.done.wait [#allocation9], 512  }
  0x49   :  { %540 = vsyncadd [#allocation9], 4294966784  ;;  %v549_v0 = vmov 0.0|0.0   ;;  %vm550_vm0 = vmmov 0   ;;  %v551_v1 = vmov 0.0   ;;  %v78_v2 = vld [vmem:[#allocation5] sm:$0xff] }
  0x4a   :  { %400 = vmatprep.subr.bf16.mxu0 %v549_v0  ;;  %375 = vmatprep.mubr.msk.f32.mxu0 %vm550_vm0, %v551_v1  ;;  %v79_v3 = vld [vmem:[#allocation5 + $0x8] sm:$0xff]  ;;  %v162_v5 = vld [vmem:[#allocation7] sm:$0xff]  ;;  %v163_v6 = vld [vmem:[#allocation7 + $0x8] sm:$0xff]  ;;  %vm87_vm1 = vcmask 130048   ;;  %vm174_vm2 = vcmask 261120   ;;  %s552_s24 = smov [#allocation10]  }
  0x4b   :  { %403 = vmatprep.subr.bf16.mxu1 %v549_v0  ;;  %386 = vmatprep.mubr.msk.f32.mxu1 %vm550_vm0, %v551_v1  ;;  %v401_v4 = vpack.c.bf16 %v79_v3, %v78_v2  ;;  %v404_v7 = vpack.c.bf16 %v163_v6, %v162_v5  ;;  %v77_v8 = vld [vmem:[#allocation2] sm:$0xff]  ;;  %v164_v9 = vld [vmem:[#allocation7 + $0x10] sm:$0xff]  ;;  %v165_v10 = vld [vmem:[#allocation7 + $0x18] sm:$0xff]  ;;  %s340_s25 = sshll.u32 %s552_s24, 4  ;;  %s341_s25 = int_to_ptr.vmem [resolvable:$true] %s340_s25 }
  0x4c   :  { %v407_v11 = vpack.c.bf16 %v165_v10, %v164_v9  ;;  %v249_v12 = vld [vmem:[#allocation8] sm:$0xff]  ;;  %v250_v13 = vld [vmem:[#allocation8 + $0x8] sm:$0xff]  ;;  %v251_v20 = vld [vmem:[#allocation8 + $0x10] sm:$0xff]  ;;  %s513_s26 = scalar_lea.vmem %s341_s25, 128  ;;  %p518_p5 = scmp.lt.s32.totalorder %s341_s25, %s341_s25 }
  0x4d   :  { %402 = vmatpush3.bf16.msra.mxu0 %v401_v4  ;;  %405 = vmatpush3.bf16.msra.mxu1 %v404_v7  ;;  %v410_v14 = vpack.c.bf16 %v250_v13, %v249_v12  ;;  %v351_v15 = vld [vmem:[%s671_s2] ss:$0 sm:$0xff]  ;;  %v252_v21 = vld [vmem:[#allocation8 + $0x18] sm:$0xff]  ;;  %v354_v23 = vld [vmem:[%s671_s2 + $0x1] ss:$0 sm:$0xff]  ;;  %p514_p4 = scmp.ne.s32.totalorder %s341_s25, %s513_s26  ;;  %p519_p6 = scmp.lt.s32.totalorder %s513_s26, %s513_s26 }
  0x4e   :  { %409 = vmatprep.subr.bf16.mxu0 %v549_v0  ;;  %406 = vmatprep.subr.bf16.mxu1 %v549_v0  ;;  %v413_v22 = vpack.c.bf16 %v252_v21, %v251_v20  ;;  %v356_v28 = vld [vmem:[%s674_s5] ss:$0 sm:$0xff] }
  0x4f   :  { %p520_p7 = por %p519_p6, %p518_p5 }
  0x50   :  { %376 = vmatmul.mubr.msk.f32.vlgmr.msra.gmra.mrb[0].mxu0 %vm87_vm1, %v77_v8 }
  0x51   :  { %397 = vmatprep.mubr.msk.f32.mxu0 %vm550_vm0, %v551_v1  ;;  %408 = vmatpush3.bf16.msra.mxu1 %v407_v11  ;;  %p521_p8 = pnand %p520_p7, %p514_p4 }
  0x52   :  { %411 = vmatpush3.bf16.msra.mxu0 %v410_v14 }
  0x53   :  { %412 = vmatprep.subr.bf16.mxu0 %v549_v0 }
  0x56   :  { %414 = vmatpush3.bf16.msra.mxu0 %v413_v22 }
 0x123   :  { %v157_v16 = vpop.f32.mrb[0].mxu0 }
 0x124   :  { %v158_v17 = vadd.f32 %v351_v15, %v157_v16  ;;  %v377_v18 = vpop.f32.mrb[1].mxu0 }
 0x126   :  { %v161_v19 = vmax.f32 %v158_v17, 0.0 }
 0x128   :  { %387 = vmatmul.mubr.msk.f32.vlgmr.msra.gmra.mrb[0].mxu1 %vm174_vm2, %v161_v19 }
 0x1fb   :  { %v244_v24 = vpop.f32.mrb[0].mxu1 }
 0x1fc   :  { %v245_v25 = vadd.f32 %v354_v23, %v244_v24  ;;  %v388_v26 = vpop.f32.mrb[1].mxu1 }
 0x1fe   :  { %v248_v27 = vmax.f32 %v245_v25, 0.0 }
 0x200   :  { %398 = vmatmul.mubr.msk.f32.vlgmr.msra.gmra.mrb[2].mxu0 %vm174_vm2, %v248_v27 }
 0x2d3   :  { %v329_v29 = vpop.f32.mrb[2].mxu0 }
 0x2d4   :  { %v330_v30 = vadd.f32 %v356_v28, %v329_v29  ;;  %v399_v31 = vpop.f32.mrb[3].mxu0 }
 0x2d6   :  { %333 = vst [vmem:[#allocation10] sm:$0xff] %v330_v30 }
 0x2d7   :  { %524 = shalt.err (!%p521_p8)
}
 0x2d8   :  { %s525_s28 = scalar_lea.hbm %s675_s6, 128 }
 0x2d9   :  { %p526_p9 = scmp.ne.s32.totalorder %s675_s6, %s525_s28  ;;  %p529_p10 = scmp.lt.u32.totalorder %s525_s28, %s675_s6 }
 0x2db   :  { %p531_p11 = pnand %p529_p10, %p526_p9 }
 0x2dd   :  { %534 = shalt.err (!%p531_p11)
}
 0x2de   :  { %343 = dma.vmem_to_hbm [thread:$0]  %s341_s25, 128, %s675_s6, [#allocation4]  }
 0x2df   :  { %541 = dma.done.wait [#allocation4], 128  }
 0x2e0   :  { %542 = vsyncadd [#allocation4], 4294967168 }
 0x2e1   :  { %347 = vsyncpa [#allocation3], 1 }
 0x2e2   :  { %348 = vsyncpa [#allocation6], 1 }
 0x2e3   :  { %349 = vsyncpa [#allocation9], 1 }
 0x2e4   :  { %350 = vsyncpa [#allocation4], 1 }

</bundles_post_ra>
